<compile_context>
chip_gen: v6e
topology: v6e:2x2x1
jax: 0.10.0
libtpu: 0.0.40
codegen_flags: <defaults>
</compile_context>

<pallas_src>
import functools

import jax
import jax.numpy as jnp
from jax.experimental import pallas as pl
from jax.experimental.pallas import tpu as pltpu

BN_EPS = 1e-5


# ---------------------------------------------------------------------------
# Host-side constant preparation (tiny, done once per call)
# ---------------------------------------------------------------------------
def _interp_matrix(in_size, out_size):
    """(out_size, in_size) 1-D bilinear interpolation matrix, align_corners=True."""
    if in_size == 1 or out_size == 1:
        src = jnp.zeros((out_size,), jnp.float32)
    else:
        src = jnp.arange(out_size, dtype=jnp.float32) * (in_size - 1) / (out_size - 1)
    i0 = jnp.clip(jnp.floor(src).astype(jnp.int32), 0, in_size - 1)
    i1 = jnp.clip(i0 + 1, 0, in_size - 1)
    frac = src - i0.astype(jnp.float32)
    rows = jnp.arange(out_size)
    m = jnp.zeros((out_size, in_size), jnp.float32)
    m = m.at[rows, i0].add(1.0 - frac)
    m = m.at[rows, i1].add(frac)
    return m


def _fold_bn(w, b, gamma, beta, mean, var, eps=BN_EPS):
    """Fold inference-mode BatchNorm into the conv weight / bias."""
    s = gamma / jnp.sqrt(var + eps)                     # per output channel
    return w * s[:, None, None, None], (b - mean) * s + beta


# ---------------------------------------------------------------------------
# Fused kernel: upsample + pad + concat + (conv3x3 + BN-folded bias + ReLU) * 2
# ---------------------------------------------------------------------------
def _up_fused_kernel(x1_ref, x2_ref, up_ref, w1_ref, b1_ref, w2_ref, b2_ref,
                     o_ref, xflat1_ref, col1_ref, xflat2_ref, col2_ref, *, Wo):
    C1 = x1_ref.shape[1]
    C2 = x2_ref.shape[1]
    HW = x2_ref.shape[2]
    Cin1 = C1 + C2
    Cmid = w1_ref.shape[0]

    # Flat-spatial x coordinate (p % Wo); used to zero the columns that wrap
    # across rows in the shifted-window (im2col) construction below.
    xpos = jax.lax.broadcasted_iota(jnp.int32, (1, HW), 1) % Wo
    left_edge = xpos == 0           # tap dx=0 reads column -1  -> must be zero
    right_edge = xpos == Wo - 1     # tap dx=2 reads column Wo  -> must be zero

    def conv3x3_relu(xflat_ref, col_ref, cin, w_ref, b_ref):
        # xflat_ref: (cin, (Ho+4)*Wo) = [2 zero rows | real rows | 2 zero rows],
        # i.e. the conv's zero padding in H is physically present; zero padding
        # in W is handled by masking the wrapped edge columns per tap.
        for k in range(9):
            dy, dx = k // 3, k % 3
            start = (dy + 1) * Wo + dx - 1            # constant flat shift per tap
            win = xflat_ref[:, start:start + HW]       # (cin, HW), lane-dense
            if dx == 0:
                win = jnp.where(left_edge, 0.0, win)
            elif dx == 2:
                win = jnp.where(right_edge, 0.0, win)
            col_ref[k * cin:(k + 1) * cin, :] = win
        # single im2col matmul: (Cout, 9*cin) @ (9*cin, HW) -> (Cout, HW)
        acc = jnp.dot(w_ref[...], col_ref[...], preferred_element_type=jnp.float32)
        return jnp.maximum(acc + b_ref[...], 0.0)      # folded-BN bias + ReLU

    # ---- conv #1 input: cat([x2, pad(upsample(x1))], channel), built in VMEM --
    xflat1_ref[...] = jnp.zeros_like(xflat1_ref)
    xflat1_ref[0:C2, 2 * Wo:2 * Wo + HW] = x2_ref[0]
    # bilinear x2 upsample (align_corners=True) + F.pad placement as one small
    # MXU matmul with the precomputed (H1*W1, Ho*Wo) interpolation matrix.
    x1u = jnp.dot(x1_ref[0], up_ref[...], preferred_element_type=jnp.float32)
    xflat1_ref[C2:Cin1, 2 * Wo:2 * Wo + HW] = x1u

    h1 = conv3x3_relu(xflat1_ref, col1_ref, Cin1, w1_ref, b1_ref)   # (Cmid, HW)

    # ---- conv #2 -------------------------------------------------------------
    xflat2_ref[...] = jnp.zeros_like(xflat2_ref)
    xflat2_ref[:, 2 * Wo:2 * Wo + HW] = h1
    h2 = conv3x3_relu(xflat2_ref, col2_ref, Cmid, w2_ref, b2_ref)   # (Cout, HW)

    o_ref[0] = h2                                       # lane-dense NCHW output


# ---------------------------------------------------------------------------
# Full `up` forward (NCHW in / NCHW out, matching PyTorch semantics)
# ---------------------------------------------------------------------------
def up_forward(x1, x2, p):
    N, C1, H1, W1 = x1.shape
    _, C2, Ho, Wo = x2.shape
    Hu, Wu = 2 * H1, 2 * W1
    diffY, diffX = Ho - Hu, Wo - Wu
    HW = Ho * Wo
    Cin1 = C1 + C2
    Cout = p['w1'].shape[0]

    # bilinear-upsample matrix (separable -> Kronecker product), with the F.pad
    # placement folded into the matrix columns.
    up_mat = jnp.kron(_interp_matrix(H1, Hu), _interp_matrix(W1, Wu)).T   # (H1*W1, Hu*Wu)
    up_mat = up_mat.reshape(H1 * W1, Hu, Wu)
    up_mat = jnp.pad(up_mat, ((0, 0),
                              (diffY // 2, diffY - diffY // 2),
                              (diffX // 2, diffX - diffX // 2)))
    up_mat = up_mat.reshape(H1 * W1, HW)

    # fold BatchNorm (eval) into the conv weights / biases
    w1f, b1f = _fold_bn(p['w1'], p['b1'], p['g1'], p['be1'], p['m1'], p['v1'])
    w2f, b2f = _fold_bn(p['w2'], p['b2'], p['g2'], p['be2'], p['m2'], p['v2'])
    # (Cout, Cin, 3, 3) -> (Cout, 9*Cin) with K index = (dy*3+dx)*Cin + c
    w1k = jnp.transpose(w1f, (0, 2, 3, 1)).reshape(Cout, 9 * Cin1)
    w2k = jnp.transpose(w2f, (0, 2, 3, 1)).reshape(Cout, 9 * Cout)
    b1k = b1f.reshape(Cout, 1)
    b2k = b2f.reshape(Cout, 1)

    x1f = x1.reshape(N, C1, H1 * W1)      # free reshapes (contiguous NCHW)
    x2f = x2.reshape(N, C2, HW)

    kernel = functools.partial(_up_fused_kernel, Wo=Wo)
    # NOTE: the weight / bias / up_mat blocks have constant index_maps; they
    # could use pipeline_mode=pl.Buffered(1) to avoid double-buffering, but the
    # VMEM footprint here is tiny so the default is kept for robustness.
    out = pl.pallas_call(
        kernel,
        out_shape=jax.ShapeDtypeStruct((N, Cout, HW), jnp.float32),
        grid_spec=pltpu.PrefetchScalarGridSpec(
            num_scalar_prefetch=0,
            grid=(N,),
            in_specs=[
                pl.BlockSpec((1, C1, H1 * W1), lambda n: (n, 0, 0)),
                pl.BlockSpec((1, C2, HW), lambda n: (n, 0, 0)),
                pl.BlockSpec((H1 * W1, HW), lambda n: (0, 0)),
                pl.BlockSpec((Cout, 9 * Cin1), lambda n: (0, 0)),
                pl.BlockSpec((Cout, 1), lambda n: (0, 0)),
                pl.BlockSpec((Cout, 9 * Cout), lambda n: (0, 0)),
                pl.BlockSpec((Cout, 1), lambda n: (0, 0)),
            ],
            out_specs=pl.BlockSpec((1, Cout, HW), lambda n: (n, 0, 0)),
            scratch_shapes=[
                pltpu.VMEM((Cin1, (Ho + 4) * Wo), jnp.float32),   # padded conv1 input
                pltpu.VMEM((9 * Cin1, HW), jnp.float32),          # conv1 im2col
                pltpu.VMEM((Cout, (Ho + 4) * Wo), jnp.float32),   # padded conv2 input
                pltpu.VMEM((9 * Cout, HW), jnp.float32),          # conv2 im2col
            ],
        ),
        compiler_params=pltpu.CompilerParams(
            dimension_semantics=("parallel",)),                   # shard batch on v7x
    )(x1f, x2f, up_mat, w1k, b1k, w2k, b2k)
    return out.reshape(N, Cout, Ho, Wo)


# ---------------------------------------------------------------------------
# Pure-JAX reference (gather bilinear + lax conv + BN eval) for correctness
# ---------------------------------------------------------------------------
def _bilinear_upsample_ref(x):
    N, C, H, W = x.shape
    Ho, Wo = 2 * H, 2 * W

    def coords(in_size, out_size):
        if in_size == 1 or out_size == 1:
            src = jnp.zeros((out_size,), jnp.float32)
        else:
            src = jnp.arange(out_size, dtype=jnp.float32) * (in_size - 1) / (out_size - 1)
        i0 = jnp.clip(jnp.floor(src).astype(jnp.int32), 0, in_size - 1)
        i1 = jnp.clip(i0 + 1, 0, in_size - 1)
        frac = src - i0.astype(jnp.float32)
        return i0, i1, frac

    iy0, iy1, fy = coords(H, Ho)
    ix0, ix1, fx = coords(W, Wo)
    top, bot = x[:, :, iy0, :], x[:, :, iy1, :]
    tl, tr = top[:, :, :, ix0], top[:, :, :, ix1]
    bl, br = bot[:, :, :, ix0], bot[:, :, :, ix1]
    wy1 = fy[:, None]; wy0 = 1.0 - wy1
    wx1 = fx[None, :]; wx0 = 1.0 - wx1
    return wy0 * wx0 * tl + wy0 * wx1 * tr + wy1 * wx0 * bl + wy1 * wx1 * br


def _ref_conv_bn_relu(x, w, b, g, be, m, v):
    z = jax.lax.conv_general_dilated(x, w, (1, 1), 'SAME',
                                     dimension_numbers=('NCHW', 'OIHW', 'NCHW'))
    z = z + b[None, :, None, None]
    y = (z - m[None, :, None, None]) * jax.lax.rsqrt(v[None, :, None, None] + BN_EPS)
    y = y * g[None, :, None, None] + be[None, :, None, None]
    return jnp.maximum(y, 0.0)


def _ref_up_forward(x1, x2, p):
    x1u = _bilinear_upsample_ref(x1)
    diffY = x2.shape[2] - x1u.shape[2]
    diffX = x2.shape[3] - x1u.shape[3]
    x1u = jnp.pad(x1u, ((0, 0), (0, 0),
                        (diffY // 2, diffY - diffY // 2),
                        (diffX // 2, diffX - diffX // 2)))
    x = jnp.concatenate([x2, x1u], axis=1)
    h = _ref_conv_bn_relu(x, p['w1'], p['b1'], p['g1'], p['be1'], p['m1'], p['v1'])
    h = _ref_conv_bn_relu(h, p['w2'], p['b2'], p['g2'], p['be2'], p['m2'], p['v2'])
    return h


# ---------------------------------------------------------------------------
def make_params(key, in_ch, out_ch):
    ks = jax.random.split(key, 4)
    return {
        'w1': 0.1 * jax.random.normal(ks[0], (out_ch, in_ch, 3, 3), jnp.float32),
        'b1': 0.05 * jax.random.normal(ks[1], (out_ch,), jnp.float32),
        'g1': 1.0 + 0.02 * jnp.arange(out_ch, dtype=jnp.float32),
        'be1': 0.03 * jnp.arange(out_ch, dtype=jnp.float32),
        'm1': 0.01 * jnp.arange(out_ch, dtype=jnp.float32),
        'v1': 1.0 + 0.05 * jnp.arange(out_ch, dtype=jnp.float32),
        'w2': 0.1 * jax.random.normal(ks[2], (out_ch, out_ch, 3, 3), jnp.float32),
        'b2': 0.05 * jax.random.normal(ks[3], (out_ch,), jnp.float32),
        'g2': 1.0 - 0.01 * jnp.arange(out_ch, dtype=jnp.float32),
        'be2': -0.02 * jnp.arange(out_ch, dtype=jnp.float32),
        'm2': 0.02 * jnp.arange(out_ch, dtype=jnp.float32),
        'v2': 1.0 + 0.03 * jnp.arange(out_ch, dtype=jnp.float32),
    }


if __name__ == "__main__":
    # up(in_ch=8, out_ch=8, bilinear=True):
    #   x1 (low-res feature from below): (N, in_ch//2, H, W)
    #   x2 (skip connection):            (N, in_ch//2, 2H, 2W)
    N, C_half, H, W = 2, 4, 8, 8
    in_ch, out_ch = 2 * C_half, 8

    key = jax.random.PRNGKey(0)
    k1, k2, kp = jax.random.split(key, 3)
    x1 = jax.random.normal(k1, (N, C_half, H, W), jnp.float32)
    x2 = jax.random.normal(k2, (N, C_half, 2 * H, 2 * W), jnp.float32)
    params = make_params(kp, in_ch, out_ch)

    up_fn = jax.jit(up_forward)
    out = jax.block_until_ready(up_fn(x1, x2, params))

    ref = jax.block_until_ready(_ref_up_forward(x1, x2, params))
    assert out.shape == (N, out_ch, 2 * H, 2 * W), out.shape
    assert jnp.allclose(out, ref, rtol=1e-4, atol=1e-4), \
        float(jnp.max(jnp.abs(out - ref)))

    print("KERNEL_OK")
</pallas_src>

<mosaic_0001>
module attributes {stable_mosaic.version = 11 : i64} {
  func.func private @main(%arg0: i32) attributes {dimension_semantics = [#tpu.dimension_semantics<core_parallel>], iteration_bounds = array<i64: 2>, tpu.core_type = #tpu.core_type<sc_scalar_subcore>, window_params = []} {
    return
  }
}

module attributes {stable_mosaic.version = 11 : i64} {
  func.func private @main(%arg0: i32) attributes {dimension_semantics = [#tpu.dimension_semantics<core_parallel>], iteration_bounds = array<i64: 2>, tpu.core_type = #tpu.core_type<sc_scalar_subcore>, window_params = []} {
    return
  }
}

module attributes {stable_mosaic.version = 11 : i64} {
  func.func @_up_fused_kernel(%arg0: i32, %arg1: memref<1x4x64xf32, #tpu.memory_space<vmem>>, %arg2: memref<1x4x256xf32, #tpu.memory_space<vmem>>, %arg3: memref<64x256xf32, #tpu.memory_space<vmem>>, %arg4: memref<8x72xf32, #tpu.memory_space<vmem>>, %arg5: memref<8x1xf32, #tpu.memory_space<vmem>>, %arg6: memref<8x72xf32, #tpu.memory_space<vmem>>, %arg7: memref<8x1xf32, #tpu.memory_space<vmem>>, %arg8: memref<1x8x256xf32, #tpu.memory_space<vmem>>, %arg9: memref<8x320xf32, #tpu.memory_space<vmem>>, %arg10: memref<72x256xf32, #tpu.memory_space<vmem>>, %arg11: memref<8x320xf32, #tpu.memory_space<vmem>>, %arg12: memref<72x256xf32, #tpu.memory_space<vmem>>) attributes {dimension_semantics = [#tpu.dimension_semantics<parallel>], iteration_bounds = array<i64: 2>, scalar_prefetch = 0 : i64, scratch_operands = 4 : i64, tpu.core_type = #tpu.core_type<tc>, window_params = [{transform_indices = @transform_0, window_bounds = array<i64: 1, 4, 64>}, {transform_indices = @transform_1, window_bounds = array<i64: 1, 4, 256>}, {pipeline_mode = #tpu.pipeline_mode<synchronous>, transform_indices = @transform_2, window_bounds = array<i64: 64, 256>}, {pipeline_mode = #tpu.pipeline_mode<synchronous>, transform_indices = @transform_3, window_bounds = array<i64: 8, 72>}, {pipeline_mode = #tpu.pipeline_mode<synchronous>, transform_indices = @transform_4, window_bounds = array<i64: 8, 1>}, {pipeline_mode = #tpu.pipeline_mode<synchronous>, transform_indices = @transform_5, window_bounds = array<i64: 8, 72>}, {pipeline_mode = #tpu.pipeline_mode<synchronous>, transform_indices = @transform_6, window_bounds = array<i64: 8, 1>}, {transform_indices = @transform_7, window_bounds = array<i64: 1, 8, 256>}]} {
    %0 = tpu.iota {dimensions = array<i32: 1>} : vector<1x256xi32>
    %c16_i32 = arith.constant 16 : i32
    %c0_i32 = arith.constant 0 : i32
    %1 = arith.cmpi eq, %c16_i32, %c0_i32 : i32
    %c1_i32 = arith.constant 1 : i32
    %2 = arith.select %1, %c1_i32, %c16_i32 : i32
    %3 = vector.broadcast %2 : i32 to vector<1x256xi32>
    %4 = arith.remsi %0, %3 : vector<1x256xi32>
    %c0_i32_0 = arith.constant 0 : i32
    %5 = vector.broadcast %c0_i32_0 : i32 to vector<1x256xi32>
    %6 = arith.cmpi ne, %4, %5 : vector<1x256xi32>
    %c0_i32_1 = arith.constant 0 : i32
    %7 = vector.broadcast %c0_i32_1 : i32 to vector<1x256xi32>
    %8 = arith.cmpi slt, %4, %7 : vector<1x256xi32>
    %c0_i32_2 = arith.constant 0 : i32
    %9 = arith.cmpi slt, %2, %c0_i32_2 : i32
    %10 = vector.broadcast %9 : i1 to vector<1x256xi1>
    %11 = vector.broadcast %10 : vector<1x256xi1> to vector<1x256xi1>
    %12 = arith.xori %8, %11 : vector<1x256xi1>
    %13 = arith.andi %12, %6 : vector<1x256xi1>
    %14 = vector.broadcast %2 : i32 to vector<1x256xi32>
    %15 = arith.addi %4, %14 : vector<1x256xi32>
    %16 = arith.select %13, %15, %4 : vector<1x256xi1>, vector<1x256xi32>
    %c0_i32_3 = arith.constant 0 : i32
    %17 = vector.broadcast %c0_i32_3 : i32 to vector<1x256xi32>
    %18 = arith.cmpi eq, %16, %17 : vector<1x256xi32>
    %c15_i32 = arith.constant 15 : i32
    %19 = vector.broadcast %c15_i32 : i32 to vector<1x256xi32>
    %20 = arith.cmpi eq, %16, %19 : vector<1x256xi32>
    %cst = arith.constant 0.000000e+00 : f32
    %21 = vector.broadcast %cst : f32 to vector<8x320xf32>
    %c0 = arith.constant 0 : index
    %c0_4 = arith.constant 0 : index
    %22 = vector.load %arg9[%c0, %c0_4] : memref<8x320xf32, #tpu.memory_space<vmem>>, vector<8x320xf32>
    tpu.vector_store %arg9[%c0, %c0_4], %21 {strides = array<i32>} : memref<8x320xf32, #tpu.memory_space<vmem>>, vector<8x320xf32>,
    %c0_5 = arith.constant 0 : index
    %c0_6 = arith.constant 0 : index
    %c0_7 = arith.constant 0 : index
    %23 = vector.load %arg2[%c0_5, %c0_6, %c0_7] : memref<1x4x256xf32, #tpu.memory_space<vmem>>, vector<1x4x256xf32>
    %24 = vector.shape_cast %23 : vector<1x4x256xf32> to vector<4x256xf32>
    %c0_8 = arith.constant 0 : index
    %c32 = arith.constant 32 : index
    %25 = vector.load %arg9[%c0_8, %c32] : memref<8x320xf32, #tpu.memory_space<vmem>>, vector<4x256xf32>
    tpu.vector_store %arg9[%c0_8, %c32], %24 {strides = array<i32>} : memref<8x320xf32, #tpu.memory_space<vmem>>, vector<4x256xf32>,
    %c0_9 = arith.constant 0 : index
    %c0_10 = arith.constant 0 : index
    %c0_11 = arith.constant 0 : index
    %26 = vector.load %arg1[%c0_9, %c0_10, %c0_11] : memref<1x4x64xf32, #tpu.memory_space<vmem>>, vector<1x4x64xf32>
    %27 = vector.shape_cast %26 : vector<1x4x64xf32> to vector<4x64xf32>
    %c0_12 = arith.constant 0 : index
    %c0_13 = arith.constant 0 : index
    %28 = vector.load %arg3[%c0_12, %c0_13] : memref<64x256xf32, #tpu.memory_space<vmem>>, vector<64x256xf32>
    %cst_14 = arith.constant dense<0.000000e+00> : vector<4x256xf32>
    %29 = tpu.matmul %27, %28, %cst_14 {dimension_numbers = #tpu.dot_dimension_numbers<[1], [0], [0], [1], [0, 0, 1, 1], [], []>} : vector<4x64xf32>, vector<64x256xf32>, vector<4x256xf32> -> vector<4x256xf32>
    %c4 = arith.constant 4 : index
    %c32_15 = arith.constant 32 : index
    %30 = vector.load %arg9[%c4, %c32_15] : memref<8x320xf32, #tpu.memory_space<vmem>>, vector<4x256xf32>
    tpu.vector_store %arg9[%c4, %c32_15], %29 {strides = array<i32>} : memref<8x320xf32, #tpu.memory_space<vmem>>, vector<4x256xf32>,
    %c0_16 = arith.constant 0 : index
    %c15 = arith.constant 15 : index
    %31 = vector.load %arg9[%c0_16, %c15] : memref<8x320xf32, #tpu.memory_space<vmem>>, vector<8x256xf32>
    %cst_17 = arith.constant 0.000000e+00 : f32
    %32 = vector.shape_cast %18 : vector<1x256xi1> to vector<1x256xi1>
    %33 = vector.broadcast %32 : vector<1x256xi1> to vector<8x256xi1>
    %34 = vector.broadcast %cst_17 : f32 to vector<8x256xf32>
    %35 = arith.select %33, %34, %31 : vector<8x256xi1>, vector<8x256xf32>
    %c0_18 = arith.constant 0 : index
    %c0_19 = arith.constant 0 : index
    %36 = vector.load %arg10[%c0_18, %c0_19] : memref<72x256xf32, #tpu.memory_space<vmem>>, vector<8x256xf32>
    tpu.vector_store %arg10[%c0_18, %c0_19], %35 {strides = array<i32>} : memref<72x256xf32, #tpu.memory_space<vmem>>, vector<8x256xf32>,
    %c0_20 = arith.constant 0 : index
    %c16 = arith.constant 16 : index
    %37 = vector.load %arg9[%c0_20, %c16] : memref<8x320xf32, #tpu.memory_space<vmem>>, vector<8x256xf32>
    %c8 = arith.constant 8 : index
    %c0_21 = arith.constant 0 : index
    %38 = vector.load %arg10[%c8, %c0_21] : memref<72x256xf32, #tpu.memory_space<vmem>>, vector<8x256xf32>
    tpu.vector_store %arg10[%c8, %c0_21], %37 {strides = array<i32>} : memref<72x256xf32, #tpu.memory_space<vmem>>, vector<8x256xf32>,
    %c0_22 = arith.constant 0 : index
    %c17 = arith.constant 17 : index
    %39 = vector.load %arg9[%c0_22, %c17] : memref<8x320xf32, #tpu.memory_space<vmem>>, vector<8x256xf32>
    %cst_23 = arith.constant 0.000000e+00 : f32
    %40 = vector.shape_cast %20 : vector<1x256xi1> to vector<1x256xi1>
    %41 = vector.broadcast %40 : vector<1x256xi1> to vector<8x256xi1>
    %42 = vector.broadcast %cst_23 : f32 to vector<8x256xf32>
    %43 = arith.select %41, %42, %39 : vector<8x256xi1>, vector<8x256xf32>
    %c16_24 = arith.constant 16 : index
    %c0_25 = arith.constant 0 : index
    %44 = vector.load %arg10[%c16_24, %c0_25] : memref<72x256xf32, #tpu.memory_space<vmem>>, vector<8x256xf32>
    tpu.vector_store %arg10[%c16_24, %c0_25], %43 {strides = array<i32>} : memref<72x256xf32, #tpu.memory_space<vmem>>, vector<8x256xf32>,
    %c0_26 = arith.constant 0 : index
    %c31 = arith.constant 31 : index
    %45 = vector.load %arg9[%c0_26, %c31] : memref<8x320xf32, #tpu.memory_space<vmem>>, vector<8x256xf32>
    %cst_27 = arith.constant 0.000000e+00 : f32
    %46 = vector.shape_cast %18 : vector<1x256xi1> to vector<1x256xi1>
    %47 = vector.broadcast %46 : vector<1x256xi1> to vector<8x256xi1>
    %48 = vector.broadcast %cst_27 : f32 to vector<8x256xf32>
    %49 = arith.select %47, %48, %45 : vector<8x256xi1>, vector<8x256xf32>
    %c24 = arith.constant 24 : index
    %c0_28 = arith.constant 0 : index
    %50 = vector.load %arg10[%c24, %c0_28] : memref<72x256xf32, #tpu.memory_space<vmem>>, vector<8x256xf32>
    tpu.vector_store %arg10[%c24, %c0_28], %49 {strides = array<i32>} : memref<72x256xf32, #tpu.memory_space<vmem>>, vector<8x256xf32>,
    %c0_29 = arith.constant 0 : index
    %c32_30 = arith.constant 32 : index
    %51 = vector.load %arg9[%c0_29, %c32_30] : memref<8x320xf32, #tpu.memory_space<vmem>>, vector<8x256xf32>
    %c32_31 = arith.constant 32 : index
    %c0_32 = arith.constant 0 : index
    %52 = vector.load %arg10[%c32_31, %c0_32] : memref<72x256xf32, #tpu.memory_space<vmem>>, vector<8x256xf32>
    tpu.vector_store %arg10[%c32_31, %c0_32], %51 {strides = array<i32>} : memref<72x256xf32, #tpu.memory_space<vmem>>, vector<8x256xf32>,
    %c0_33 = arith.constant 0 : index
    %c33 = arith.constant 33 : index
    %53 = vector.load %arg9[%c0_33, %c33] : memref<8x320xf32, #tpu.memory_space<vmem>>, vector<8x256xf32>
    %cst_34 = arith.constant 0.000000e+00 : f32
    %54 = vector.shape_cast %20 : vector<1x256xi1> to vector<1x256xi1>
    %55 = vector.broadcast %54 : vector<1x256xi1> to vector<8x256xi1>
    %56 = vector.broadcast %cst_34 : f32 to vector<8x256xf32>
    %57 = arith.select %55, %56, %53 : vector<8x256xi1>, vector<8x256xf32>
    %c40 = arith.constant 40 : index
    %c0_35 = arith.constant 0 : index
    %58 = vector.load %arg10[%c40, %c0_35] : memref<72x256xf32, #tpu.memory_space<vmem>>, vector<8x256xf32>
    tpu.vector_store %arg10[%c40, %c0_35], %57 {strides = array<i32>} : memref<72x256xf32, #tpu.memory_space<vmem>>, vector<8x256xf32>,
    %c0_36 = arith.constant 0 : index
    %c47 = arith.constant 47 : index
    %59 = vector.load %arg9[%c0_36, %c47] : memref<8x320xf32, #tpu.memory_space<vmem>>, vector<8x256xf32>
    %cst_37 = arith.constant 0.000000e+00 : f32
    %60 = vector.shape_cast %18 : vector<1x256xi1> to vector<1x256xi1>
    %61 = vector.broadcast %60 : vector<1x256xi1> to vector<8x256xi1>
    %62 = vector.broadcast %cst_37 : f32 to vector<8x256xf32>
    %63 = arith.select %61, %62, %59 : vector<8x256xi1>, vector<8x256xf32>
    %c48 = arith.constant 48 : index
    %c0_38 = arith.constant 0 : index
    %64 = vector.load %arg10[%c48, %c0_38] : memref<72x256xf32, #tpu.memory_space<vmem>>, vector<8x256xf32>
    tpu.vector_store %arg10[%c48, %c0_38], %63 {strides = array<i32>} : memref<72x256xf32, #tpu.memory_space<vmem>>, vector<8x256xf32>,
    %c0_39 = arith.constant 0 : index
    %c48_40 = arith.constant 48 : index
    %65 = vector.load %arg9[%c0_39, %c48_40] : memref<8x320xf32, #tpu.memory_space<vmem>>, vector<8x256xf32>
    %c56 = arith.constant 56 : index
    %c0_41 = arith.constant 0 : index
    %66 = vector.load %arg10[%c56, %c0_41] : memref<72x256xf32, #tpu.memory_space<vmem>>, vector<8x256xf32>
    tpu.vector_store %arg10[%c56, %c0_41], %65 {strides = array<i32>} : memref<72x256xf32, #tpu.memory_space<vmem>>, vector<8x256xf32>,
    %c0_42 = arith.constant 0 : index
    %c49 = arith.constant 49 : index
    %67 = vector.load %arg9[%c0_42, %c49] : memref<8x320xf32, #tpu.memory_space<vmem>>, vector<8x256xf32>
    %cst_43 = arith.constant 0.000000e+00 : f32
    %68 = vector.shape_cast %20 : vector<1x256xi1> to vector<1x256xi1>
    %69 = vector.broadcast %68 : vector<1x256xi1> to vector<8x256xi1>
    %70 = vector.broadcast %cst_43 : f32 to vector<8x256xf32>
    %71 = arith.select %69, %70, %67 : vector<8x256xi1>, vector<8x256xf32>
    %c64 = arith.constant 64 : index
    %c0_44 = arith.constant 0 : index
    %72 = vector.load %arg10[%c64, %c0_44] : memref<72x256xf32, #tpu.memory_space<vmem>>, vector<8x256xf32>
    tpu.vector_store %arg10[%c64, %c0_44], %71 {strides = array<i32>} : memref<72x256xf32, #tpu.memory_space<vmem>>, vector<8x256xf32>,
    %c0_45 = arith.constant 0 : index
    %c0_46 = arith.constant 0 : index
    %73 = vector.load %arg4[%c0_45, %c0_46] : memref<8x72xf32, #tpu.memory_space<vmem>>, vector<8x72xf32>
    %c0_47 = arith.constant 0 : index
    %c0_48 = arith.constant 0 : index
    %74 = vector.load %arg10[%c0_47, %c0_48] : memref<72x256xf32, #tpu.memory_space<vmem>>, vector<72x256xf32>
    %cst_49 = arith.constant dense<0.000000e+00> : vector<8x256xf32>
    %75 = tpu.matmul %73, %74, %cst_49 {dimension_numbers = #tpu.dot_dimension_numbers<[1], [0], [0], [1], [0, 0, 1, 1], [], []>} : vector<8x72xf32>, vector<72x256xf32>, vector<8x256xf32> -> vector<8x256xf32>
    %c0_50 = arith.constant 0 : index
    %c0_51 = arith.constant 0 : index
    %76 = vector.load %arg5[%c0_50, %c0_51] : memref<8x1xf32, #tpu.memory_space<vmem>>, vector<8x1xf32>
    %77 = vector.broadcast %76 : vector<8x1xf32> to vector<8x256xf32>
    %78 = arith.addf %75, %77 : vector<8x256xf32>
    %cst_52 = arith.constant 0.000000e+00 : f32
    %79 = vector.broadcast %cst_52 : f32 to vector<8x256xf32>
    %80 = arith.maximumf %78, %79 : vector<8x256xf32>
    %cst_53 = arith.constant 0.000000e+00 : f32
    %81 = vector.broadcast %cst_53 : f32 to vector<8x320xf32>
    %c0_54 = arith.constant 0 : index
    %c0_55 = arith.constant 0 : index
    %82 = vector.load %arg11[%c0_54, %c0_55] : memref<8x320xf32, #tpu.memory_space<vmem>>, vector<8x320xf32>
    tpu.vector_store %arg11[%c0_54, %c0_55], %81 {strides = array<i32>} : memref<8x320xf32, #tpu.memory_space<vmem>>, vector<8x320xf32>,
    %c0_56 = arith.constant 0 : index
    %c32_57 = arith.constant 32 : index
    %83 = vector.load %arg11[%c0_56, %c32_57] : memref<8x320xf32, #tpu.memory_space<vmem>>, vector<8x256xf32>
    tpu.vector_store %arg11[%c0_56, %c32_57], %80 {strides = array<i32>} : memref<8x320xf32, #tpu.memory_space<vmem>>, vector<8x256xf32>,
    %c0_58 = arith.constant 0 : index
    %c15_59 = arith.constant 15 : index
    %84 = vector.load %arg11[%c0_58, %c15_59] : memref<8x320xf32, #tpu.memory_space<vmem>>, vector<8x256xf32>
    %cst_60 = arith.constant 0.000000e+00 : f32
    %85 = vector.shape_cast %18 : vector<1x256xi1> to vector<1x256xi1>
    %86 = vector.broadcast %85 : vector<1x256xi1> to vector<8x256xi1>
    %87 = vector.broadcast %cst_60 : f32 to vector<8x256xf32>
    %88 = arith.select %86, %87, %84 : vector<8x256xi1>, vector<8x256xf32>
    %c0_61 = arith.constant 0 : index
    %c0_62 = arith.constant 0 : index
    %89 = vector.load %arg12[%c0_61, %c0_62] : memref<72x256xf32, #tpu.memory_space<vmem>>, vector<8x256xf32>
    tpu.vector_store %arg12[%c0_61, %c0_62], %88 {strides = array<i32>} : memref<72x256xf32, #tpu.memory_space<vmem>>, vector<8x256xf32>,
    %c0_63 = arith.constant 0 : index
    %c16_64 = arith.constant 16 : index
    %90 = vector.load %arg11[%c0_63, %c16_64] : memref<8x320xf32, #tpu.memory_space<vmem>>, vector<8x256xf32>
    %c8_65 = arith.constant 8 : index
    %c0_66 = arith.constant 0 : index
    %91 = vector.load %arg12[%c8_65, %c0_66] : memref<72x256xf32, #tpu.memory_space<vmem>>, vector<8x256xf32>
    tpu.vector_store %arg12[%c8_65, %c0_66], %90 {strides = array<i32>} : memref<72x256xf32, #tpu.memory_space<vmem>>, vector<8x256xf32>,
    %c0_67 = arith.constant 0 : index
    %c17_68 = arith.constant 17 : index
    %92 = vector.load %arg11[%c0_67, %c17_68] : memref<8x320xf32, #tpu.memory_space<vmem>>, vector<8x256xf32>
    %cst_69 = arith.constant 0.000000e+00 : f32
    %93 = vector.shape_cast %20 : vector<1x256xi1> to vector<1x256xi1>
    %94 = vector.broadcast %93 : vector<1x256xi1> to vector<8x256xi1>
    %95 = vector.broadcast %cst_69 : f32 to vector<8x256xf32>
    %96 = arith.select %94, %95, %92 : vector<8x256xi1>, vector<8x256xf32>
    %c16_70 = arith.constant 16 : index
    %c0_71 = arith.constant 0 : index
    %97 = vector.load %arg12[%c16_70, %c0_71] : memref<72x256xf32, #tpu.memory_space<vmem>>, vector<8x256xf32>
    tpu.vector_store %arg12[%c16_70, %c0_71], %96 {strides = array<i32>} : memref<72x256xf32, #tpu.memory_space<vmem>>, vector<8x256xf32>,
    %c0_72 = arith.constant 0 : index
    %c31_73 = arith.constant 31 : index
    %98 = vector.load %arg11[%c0_72, %c31_73] : memref<8x320xf32, #tpu.memory_space<vmem>>, vector<8x256xf32>
    %cst_74 = arith.constant 0.000000e+00 : f32
    %99 = vector.shape_cast %18 : vector<1x256xi1> to vector<1x256xi1>
    %100 = vector.broadcast %99 : vector<1x256xi1> to vector<8x256xi1>
    %101 = vector.broadcast %cst_74 : f32 to vector<8x256xf32>
    %102 = arith.select %100, %101, %98 : vector<8x256xi1>, vector<8x256xf32>
    %c24_75 = arith.constant 24 : index
    %c0_76 = arith.constant 0 : index
    %103 = vector.load %arg12[%c24_75, %c0_76] : memref<72x256xf32, #tpu.memory_space<vmem>>, vector<8x256xf32>
    tpu.vector_store %arg12[%c24_75, %c0_76], %102 {strides = array<i32>} : memref<72x256xf32, #tpu.memory_space<vmem>>, vector<8x256xf32>,
    %c0_77 = arith.constant 0 : index
    %c32_78 = arith.constant 32 : index
    %104 = vector.load %arg11[%c0_77, %c32_78] : memref<8x320xf32, #tpu.memory_space<vmem>>, vector<8x256xf32>
    %c32_79 = arith.constant 32 : index
    %c0_80 = arith.constant 0 : index
    %105 = vector.load %arg12[%c32_79, %c0_80] : memref<72x256xf32, #tpu.memory_space<vmem>>, vector<8x256xf32>
    tpu.vector_store %arg12[%c32_79, %c0_80], %104 {strides = array<i32>} : memref<72x256xf32, #tpu.memory_space<vmem>>, vector<8x256xf32>,
    %c0_81 = arith.constant 0 : index
    %c33_82 = arith.constant 33 : index
    %106 = vector.load %arg11[%c0_81, %c33_82] : memref<8x320xf32, #tpu.memory_space<vmem>>, vector<8x256xf32>
    %cst_83 = arith.constant 0.000000e+00 : f32
    %107 = vector.shape_cast %20 : vector<1x256xi1> to vector<1x256xi1>
    %108 = vector.broadcast %107 : vector<1x256xi1> to vector<8x256xi1>
    %109 = vector.broadcast %cst_83 : f32 to vector<8x256xf32>
    %110 = arith.select %108, %109, %106 : vector<8x256xi1>, vector<8x256xf32>
    %c40_84 = arith.constant 40 : index
    %c0_85 = arith.constant 0 : index
    %111 = vector.load %arg12[%c40_84, %c0_85] : memref<72x256xf32, #tpu.memory_space<vmem>>, vector<8x256xf32>
    tpu.vector_store %arg12[%c40_84, %c0_85], %110 {strides = array<i32>} : memref<72x256xf32, #tpu.memory_space<vmem>>, vector<8x256xf32>,
    %c0_86 = arith.constant 0 : index
    %c47_87 = arith.constant 47 : index
    %112 = vector.load %arg11[%c0_86, %c47_87] : memref<8x320xf32, #tpu.memory_space<vmem>>, vector<8x256xf32>
    %cst_88 = arith.constant 0.000000e+00 : f32
    %113 = vector.shape_cast %18 : vector<1x256xi1> to vector<1x256xi1>
    %114 = vector.broadcast %113 : vector<1x256xi1> to vector<8x256xi1>
    %115 = vector.broadcast %cst_88 : f32 to vector<8x256xf32>
    %116 = arith.select %114, %115, %112 : vector<8x256xi1>, vector<8x256xf32>
    %c48_89 = arith.constant 48 : index
    %c0_90 = arith.constant 0 : index
    %117 = vector.load %arg12[%c48_89, %c0_90] : memref<72x256xf32, #tpu.memory_space<vmem>>, vector<8x256xf32>
    tpu.vector_store %arg12[%c48_89, %c0_90], %116 {strides = array<i32>} : memref<72x256xf32, #tpu.memory_space<vmem>>, vector<8x256xf32>,
    %c0_91 = arith.constant 0 : index
    %c48_92 = arith.constant 48 : index
    %118 = vector.load %arg11[%c0_91, %c48_92] : memref<8x320xf32, #tpu.memory_space<vmem>>, vector<8x256xf32>
    %c56_93 = arith.constant 56 : index
    %c0_94 = arith.constant 0 : index
    %119 = vector.load %arg12[%c56_93, %c0_94] : memref<72x256xf32, #tpu.memory_space<vmem>>, vector<8x256xf32>
    tpu.vector_store %arg12[%c56_93, %c0_94], %118 {strides = array<i32>} : memref<72x256xf32, #tpu.memory_space<vmem>>, vector<8x256xf32>,
    %c0_95 = arith.constant 0 : index
    %c49_96 = arith.constant 49 : index
    %120 = vector.load %arg11[%c0_95, %c49_96] : memref<8x320xf32, #tpu.memory_space<vmem>>, vector<8x256xf32>
    %cst_97 = arith.constant 0.000000e+00 : f32
    %121 = vector.shape_cast %20 : vector<1x256xi1> to vector<1x256xi1>
    %122 = vector.broadcast %121 : vector<1x256xi1> to vector<8x256xi1>
    %123 = vector.broadcast %cst_97 : f32 to vector<8x256xf32>
    %124 = arith.select %122, %123, %120 : vector<8x256xi1>, vector<8x256xf32>
    %c64_98 = arith.constant 64 : index
    %c0_99 = arith.constant 0 : index
    %125 = vector.load %arg12[%c64_98, %c0_99] : memref<72x256xf32, #tpu.memory_space<vmem>>, vector<8x256xf32>
    tpu.vector_store %arg12[%c64_98, %c0_99], %124 {strides = array<i32>} : memref<72x256xf32, #tpu.memory_space<vmem>>, vector<8x256xf32>,
    %c0_100 = arith.constant 0 : index
    %c0_101 = arith.constant 0 : index
    %126 = vector.load %arg6[%c0_100, %c0_101] : memref<8x72xf32, #tpu.memory_space<vmem>>, vector<8x72xf32>
    %c0_102 = arith.constant 0 : index
    %c0_103 = arith.constant 0 : index
    %127 = vector.load %arg12[%c0_102, %c0_103] : memref<72x256xf32, #tpu.memory_space<vmem>>, vector<72x256xf32>
    %cst_104 = arith.constant dense<0.000000e+00> : vector<8x256xf32>
    %128 = tpu.matmul %126, %127, %cst_104 {dimension_numbers = #tpu.dot_dimension_numbers<[1], [0], [0], [1], [0, 0, 1, 1], [], []>} : vector<8x72xf32>, vector<72x256xf32>, vector<8x256xf32> -> vector<8x256xf32>
    %c0_105 = arith.constant 0 : index
    %c0_106 = arith.constant 0 : index
    %129 = vector.load %arg7[%c0_105, %c0_106] : memref<8x1xf32, #tpu.memory_space<vmem>>, vector<8x1xf32>
    %130 = vector.broadcast %129 : vector<8x1xf32> to vector<8x256xf32>
    %131 = arith.addf %128, %130 : vector<8x256xf32>
    %cst_107 = arith.constant 0.000000e+00 : f32
    %132 = vector.broadcast %cst_107 : f32 to vector<8x256xf32>
    %133 = arith.maximumf %131, %132 : vector<8x256xf32>
    %c0_108 = arith.constant 0 : index
    %c0_109 = arith.constant 0 : index
    %c0_110 = arith.constant 0 : index
    %134 = vector.load %arg8[%c0_108, %c0_109, %c0_110] : memref<1x8x256xf32, #tpu.memory_space<vmem>>, vector<1x8x256xf32>
    %135 = vector.shape_cast %134 : vector<1x8x256xf32> to vector<8x256xf32>
    %136 = vector.shape_cast %133 : vector<8x256xf32> to vector<1x8x256xf32>
    tpu.vector_store %arg8[%c0_108, %c0_109, %c0_110], %136 {strides = array<i32>} : memref<1x8x256xf32, #tpu.memory_space<vmem>>, vector<1x8x256xf32>,
    return
  }
  func.func @transform_0(%arg0: i32) -> (i32, i32, i32) {
    %c0_i32 = arith.constant 0 : i32
    %c0_i32_0 = arith.constant 0 : i32
    %c0_i32_1 = arith.constant 0 : i32
    return %arg0, %c0_i32, %c0_i32_0 : i32, i32, i32
  }
  func.func @transform_1(%arg0: i32) -> (i32, i32, i32) {
    %c0_i32 = arith.constant 0 : i32
    %c0_i32_0 = arith.constant 0 : i32
    %c0_i32_1 = arith.constant 0 : i32
    return %arg0, %c0_i32, %c0_i32_0 : i32, i32, i32
  }
  func.func @transform_2(%arg0: i32) -> (i32, i32) {
    %c0_i32 = arith.constant 0 : i32
    %c0_i32_0 = arith.constant 0 : i32
    %c0_i32_1 = arith.constant 0 : i32
    return %c0_i32, %c0_i32_0 : i32, i32
  }
  func.func @transform_3(%arg0: i32) -> (i32, i32) {
    %c0_i32 = arith.constant 0 : i32
    %c0_i32_0 = arith.constant 0 : i32
    %c0_i32_1 = arith.constant 0 : i32
    return %c0_i32, %c0_i32_0 : i32, i32
  }
  func.func @transform_4(%arg0: i32) -> (i32, i32) {
    %c0_i32 = arith.constant 0 : i32
    %c0_i32_0 = arith.constant 0 : i32
    %c0_i32_1 = arith.constant 0 : i32
    return %c0_i32, %c0_i32_0 : i32, i32
  }
  func.func @transform_5(%arg0: i32) -> (i32, i32) {
    %c0_i32 = arith.constant 0 : i32
    %c0_i32_0 = arith.constant 0 : i32
    %c0_i32_1 = arith.constant 0 : i32
    return %c0_i32, %c0_i32_0 : i32, i32
  }
  func.func @transform_6(%arg0: i32) -> (i32, i32) {
    %c0_i32 = arith.constant 0 : i32
    %c0_i32_0 = arith.constant 0 : i32
    %c0_i32_1 = arith.constant 0 : i32
    return %c0_i32, %c0_i32_0 : i32, i32
  }
  func.func @transform_7(%arg0: i32) -> (i32, i32, i32) {
    %c0_i32 = arith.constant 0 : i32
    %c0_i32_0 = arith.constant 0 : i32
    %c0_i32_1 = arith.constant 0 : i32
    return %arg0, %c0_i32, %c0_i32_0 : i32, i32, i32
  }
}

</mosaic_0001>

<bundles_post_ra>
// kernel: up_forward.1
= control target key start
LH: loop header
LB: loop body
LE: loop exit
PB: predicated region body
PF: predicated region fallthrough
CT: control target
= control target key end

     0   :  { %s1262_s24 = smov 0   ;;  %s1523_s0 = inlined_call_operand.vmem [shape: f32[2,4,64], index: 0, kind: input, shape index: {}]   ;;  %s1524_s1 = inlined_call_operand.vmem [shape: f32[2,4,256], index: 1, kind: input, shape index: {}]   ;;  %s1525_s2 = inlined_call_operand.vmem [shape: f32[64,256], index: 2, kind: input, shape index: {}]   ;;  %s1526_s3 = inlined_call_operand.vmem [shape: f32[8,72], index: 3, kind: input, shape index: {}]   ;;  %s1527_s4 = inlined_call_operand.vmem [shape: f32[8,1], index: 4, kind: input, shape index: {}]   ;;  %s1528_s5 = inlined_call_operand.vmem [shape: f32[8,72], index: 5, kind: input, shape index: {}]   ;;  %s1529_s6 = inlined_call_operand.vmem [shape: f32[8,1], index: 6, kind: input, shape index: {}]   ;;  %s1530_s7 = inlined_call_operand.vmem [shape: f32[2,8,256], index: 7, kind: output, shape index: {}]  }
   0x1 LB: > { %s1110_s25 = sadd.s32 4294967295, %s1208_s24   ;;  %p1114_p0 = scmp.ge.s32.totalorder %s1208_s24, 1  ;;  %s1208_s24 = sphi %s1262_s24, %s17_s24  }
   0x2   : > { %p246_p1 = scmp.lt.s32.totalorder %s1208_s24, 3 }
   0x4   : > { %p247_p2 = pnand %p1114_p0, %p246_p1 }
   0x5   : > { %p282_p3 = scmp.lt.s32.totalorder (!%p247_p2), %s1110_s25, 1  ;;  %s1211_s29 = smov (!%p247_p2), 32  }
   0x6   : > { %250 = sbr.rel (%p247_p2) target bundleno = 1204 (0x4b4), region = 48  ;;  %s1212_s23 = smov (!%p247_p2), 79  }
   0x7   : > { %s1213_s26 = smov (!%p247_p2), 80   ;;  %s1214_s27 = smov (!%p247_p2), 81  }
   0x8   : > { %s1215_s28 = smov (!%p247_p2), 95   ;;  %s1216_s30 = smov (!%p247_p2), 96  }
   0x9   : > { %s1217_s8 = smov (!%p247_p2), 97   ;;  %s1219_s10 = smov (!%p247_p2), 112  }
   0xa   : > { %s1221_s11 = smov (!%p247_p2), 113  }
   0xb   : > { %v364_v0 = vld [vmem:[%s1525_s2 + $0x78] sm:$0xff]  ;;  %v363_v1 = vld [vmem:[%s1525_s2 + $0x70] sm:$0xff]  ;;  %v362_v2 = vld [vmem:[%s1525_s2 + $0x68] sm:$0xff]  ;;  %vm329_vm0 = vcmask 523264   ;;  %v1210_v4 = vmov 0.0   ;;  %s1540_s25 = smov (!%p282_p3, %s1110_s25), 1  ;;  %v296_v31 = vlaneseq }
   0xc   : > { %384 = vmatprep.subr.mxu0 %v364_v0  ;;  %v361_v3 = vld [vmem:[%s1525_s2 + $0x60] sm:$0xff]  ;;  %432 = vmatprep.mubr.f32.mxu0 %v1210_v4  ;;  %327 = vst [vmem:[#allocation2] sm:$0xff] %v1210_v4  ;;  %328 = vst [vmem:[#allocation2 + $0x8] sm:$0xff] %v1210_v4  ;;  %v360_v5 = vld [vmem:[%s1525_s2 + $0x58] sm:$0xff]  ;;  %s1125_s17 = sshll.u32 %s1540_s25, 3  ;;  %s1115_s9 = sshll.u32 %s1540_s25, 2 }
   0xd   : > { %749 = vst [vmem:[#allocation4] sm:$0xff] %v1210_v4  ;;  %330 = vst.msk [vmem:[#allocation2 + $0x10] sm:$0xff] %vm329_vm0, %v1210_v4  ;;  %385 = vmatpush1.msra.mxu0 %v363_v1  ;;  %740 = vmatprep.mubr.f32.mxu1 %v1210_v4  ;;  %v359_v6 = vld [vmem:[%s1525_s2 + $0x50] sm:$0xff]  ;;  %v358_v7 = vld [vmem:[%s1525_s2 + $0x48] sm:$0xff]  ;;  %s290_s22 = scalar_lea.vmem %s1524_s1, %s1125_s17  ;;  %s285_s18 = scalar_lea.vmem %s1523_s0, %s1115_s9  ;;  %vm343_vm1 = vcmask 1043712   ;;  %vm338_vm2 = vcmask 261120  }
   0xe   : > { %751 = vst.msk [vmem:[#allocation4 + $0x10] sm:$0xff] %vm329_vm0, %v1210_v4  ;;  %386 = vmatprep.subr.mxu0 %v362_v2  ;;  %v357_v8 = vld [vmem:[%s1525_s2 + $0x40] sm:$0xff]  ;;  %v356_v9 = vld [vmem:[%s1525_s2 + $0x38] sm:$0xff]  ;;  %v355_v11 = vld [vmem:[%s1525_s2 + $0x30] sm:$0xff]  ;;  %vm346_vm3 = vcmask 257024   ;;  %vm451_vm4 = vcmask 1047812  }
   0xf   : > { %387 = vmatpush1.msra.mxu0 %v361_v3  ;;  %v331_v10 = vld [vmem:[%s290_s22] sm:$0xff]  ;;  %v354_v13 = vld [vmem:[%s1525_s2 + $0x28] sm:$0xff]  ;;  %v352_v15 = vld [vmem:[%s1525_s2 + $0x18] sm:$0xff]  ;;  %vm454_vm5 = vcmask 261124   ;;  %s1218_s9 = smov 111   ;;  %v1345_v32 = vand.u32 127, %v296_v31 }
  0x10   : > { %388 = vmatprep.subr.mxu0 %v360_v5  ;;  %334 = vrot.lane.b32.xlu0 %v331_v10, %s1211_s29  ;;  %v333_v12 = vcombine.high %v331_v10, %v331_v10  ;;  %v353_v14 = vld [vmem:[%s1525_s2 + $0x20] sm:$0xff]  ;;  %v351_v16 = vld [vmem:[%s1525_s2 + $0x10] sm:$0xff]  ;;  %v350_v17 = vld [vmem:[%s1525_s2 + $0x8] sm:$0xff]  ;;  %v1220_v38 = vmov 0   ;;  %vm638_vm6 = vcmask 646144   ;;  %vm619_vm9 = vcmask 654336  }
  0x11   : > { %389 = vmatpush1.msra.mxu0 %v359_v6  ;;  %v349_v18 = vld [vmem:[%s1525_s2] sm:$0xff]  ;;  %v298_v34 = vadd.s32 128, %v1345_v32  ;;  %v303_v36 = vand.u32 15, %v1345_v32  ;;  %1199 = vset.pattern.permute.xlu1 %v1220_v38  ;;  %vm598_vm10 = vcmask 662528   ;;  %vm577_vm12 = vcmask 777216   ;;  %s1126_s19 = sshll.u32 %s1540_s25, 4 }
  0x12   : > { %390 = vmatprep.subr.mxu0 %v358_v7  ;;  %v348_v19 = vld [vmem:[%s285_s18] sm:$0xf]  ;;  %1200 = vset.pattern.permute.xlu0 %v1220_v38  ;;  %vm558_vm14 = vcmask 785408   ;;  %vm537_vm15 = vcmask 793600   ;;  %s295_s22 = scalar_lea.vmem %s1530_s7, %s1126_s19 }
  0x13   : > { %391 = vmatpush1.msra.mxu0 %v357_v8  ;;  %v310_v35 = vand.u32 15, %v298_v34  ;;  %v666_v39 = vld [vmem:[%s1527_s4] sm:$0xff]  ;;  %vm1377_vm8 = vcmp.ne.s32.totalorder %v303_v36, 15  ;;  %vm1393_vm13 = vcmp.ne.s32.totalorder %v303_v36, 0 }
  0x14   : > { %392 = vmatprep.subr.mxu0 %v356_v9  ;;  %336 = vrot.lane.b32.xlu0 %v333_v12, %s1211_s29  ;;  %v959_v38 = vld [vmem:[%s1529_s6] sm:$0xff] }
  0x15   : > { %393 = vmatpush1.msra.mxu0 %v355_v11  ;;  %vm1373_vm7 = vcmp.ne.s32.totalorder %v310_v35, 15  ;;  %vm1388_vm11 = vcmp.ne.s32.totalorder %v310_v35, 0  ;;  %v940_v56 = vld [vmem:[%s1528_s5] sm:$0xff] }
  0x16   : > { %394 = vmatprep.subr.mxu0 %v354_v13 }
  0x17   : > { %395 = vmatpush1.msra.mxu0 %v353_v14 }
  0x18   : > { %396 = vmatprep.subr.mxu0 %v352_v15 }
  0x19   : > { %397 = vmatpush1.msra.mxu0 %v351_v16 }
  0x1a   : > { %398 = vmatprep.subr.mxu0 %v350_v17 }
  0x1b   : > { %399 = vmatpush1.msra.mxu0 %v349_v18 }
  0x1c   : > { %1120 = vmatmul.mubr.msk.f32.vlgmr.msra.gmra.mxu0 %vm329_vm0, %v348_v19  ;;  %vm516_vm0 = vcmask 908288  }
  0x1d   : > { %1032 = vmatprep.mubr.f32.mxu0 %v1210_v4 }
  0x82   : > { %v335_v20 = vpop.permute.xlu0 %334 }
  0x83   : > { %344 = vst.msk [vmem:[#allocation2] sm:$0xf] %vm343_vm1, %v335_v20  ;;  %vm493_vm1 = vcmask 916480  }
  0x86   : > { %v337_v21 = vpop.permute.xlu0 %336 }
  0x87   : > { %v339_v22 = vsel %vm338_vm2, %v335_v20, %v337_v21  ;;  %347 = vst.msk [vmem:[#allocation2 + $0x10] sm:$0xf] %vm346_vm3, %v337_v21  ;;  %vm472_vm3 = vcmask 924672  }
  0x88   : > { %345 = vst [vmem:[#allocation2 + $0x8] sm:$0xf] %v339_v22 }
  0xdc   : > { %v434_v23 = vpop.f32.mrf.mxu0 }
  0xdd   : > { %v441_v24 = vrot.slane %v434_v23, 4 }
  0xde   : > { %v436_v25 = vpop.f32.mrf.mxu0 }
  0xdf   : > { %443 = vrot.lane.b32.xlu1 %v441_v24, %s1211_s29  ;;  %v442_v26 = vrot.slane %v436_v25, 4  ;;  %v647_v24 = vld [vmem:[%s1526_s3] sm:$0xff] }
  0xe3   : > { %445 = vrot.lane.b32.xlu1 %v442_v26, %s1211_s29 }
 0x151   : > { %v444_v27 = vpop.permute.xlu1 %443 }
 0x152   : > { %452 = vst.msk [vmem:[#allocation2] sm:$0xf0] %vm451_vm4, %v444_v27  ;;  %vm672_vm4 = vcmask 588800  }
 0x155   : > { %v446_v28 = vpop.permute.xlu1 %445 }
 0x156   : > { %v447_v29 = vsel %vm338_vm2, %v444_v27, %v446_v28  ;;  %455 = vst.msk [vmem:[#allocation2 + $0x10] sm:$0xf0] %vm454_vm5, %v446_v28  ;;  %vm762_vm5 = vcmask 1047808  }
 0x157   : > { %453 = vst [vmem:[#allocation2 + $0x8] sm:$0xf0] %v447_v29 }
 0x159   : > { %v626_v30 = vld [vmem:[#allocation2] sm:$0xff] }
 0x15a   : > { %632 = vrot.lane.b32.xlu0 %v626_v30, %s1212_s23  ;;  %613 = vrot.lane.b32.xlu1 %v626_v30, %s1213_s26 }
 0x15d   : > { %v628_v33 = vld [vmem:[#allocation2 + $0x10] sm:$0xff] }
 0x15e   : > { %592 = vrot.lane.b32.xlu0 %v626_v30, %s1214_s27  ;;  %571 = vrot.lane.b32.xlu1 %v626_v30, %s1215_s28  ;;  %v627_v37 = vld [vmem:[#allocation2 + $0x8] sm:$0xff] }
 0x162   : > { %552 = vrot.lane.b32.xlu0 %v626_v30, %s1216_s30  ;;  %531 = vrot.lane.b32.xlu1 %v626_v30, %s1217_s8 }
 0x166   : > { %510 = vrot.lane.b32.xlu0 %v626_v30, %s1218_s9  ;;  %487 = vrot.lane.b32.xlu1 %v626_v30, %s1219_s10 }
 0x16a   : > { %636 = vrot.lane.b32.xlu1 %v628_v33, %s1212_s23  ;;  %617 = vrot.lane.b32.xlu0 %v628_v33, %s1213_s26 }
 0x16e   : > { %596 = vrot.lane.b32.xlu1 %v628_v33, %s1214_s27  ;;  %575 = vrot.lane.b32.xlu0 %v628_v33, %s1215_s28 }
 0x172   : > { %556 = vrot.lane.b32.xlu1 %v628_v33, %s1216_s30  ;;  %535 = vrot.lane.b32.xlu0 %v628_v33, %s1217_s8 }
 0x176   : > { %514 = vrot.lane.b32.xlu1 %v628_v33, %s1218_s9  ;;  %491 = vrot.lane.b32.xlu0 %v628_v33, %s1219_s10 }
 0x17a   : > { %634 = vrot.lane.b32.xlu0 %v627_v37, %s1212_s23  ;;  %615 = vrot.lane.b32.xlu1 %v627_v37, %s1213_s26 }
 0x17e   : > { %594 = vrot.lane.b32.xlu0 %v627_v37, %s1214_s27  ;;  %573 = vrot.lane.b32.xlu1 %v627_v37, %s1215_s28 }
 0x182   : > { %554 = vrot.lane.b32.xlu0 %v627_v37, %s1216_s30  ;;  %533 = vrot.lane.b32.xlu1 %v627_v37, %s1217_s8 }
 0x186   : > { %512 = vrot.lane.b32.xlu0 %v627_v37, %s1218_s9  ;;  %489 = vrot.lane.b32.xlu1 %v627_v37, %s1219_s10 }
 0x18a   : > { %470 = vrot.lane.b32.xlu1 %v628_v33, %s1221_s11  ;;  %468 = vrot.lane.b32.xlu0 %v627_v37, %s1221_s11 }
 0x18e   : > { %466 = vrot.lane.b32.xlu0 %v626_v30, %s1221_s11  ;;  %669 = vperm.xlu1 %1199, %v666_v39  }
 0x1cc   : > { %v633_v40 = vpop.permute.xlu0 %632  ;;  %v614_v41 = vpop.permute.xlu1 %613 }
 0x1d0   : > { %v593_v42 = vpop.permute.xlu0 %592  ;;  %v572_v43 = vpop.permute.xlu1 %571 }
 0x1d4   : > { %v553_v44 = vpop.permute.xlu0 %552  ;;  %v532_v45 = vpop.permute.xlu1 %531 }
 0x1d8   : > { %v511_v46 = vpop.permute.xlu0 %510  ;;  %v1371_v47 = vpop.permute.xlu1 %487 }
 0x1dc   : > { %v618_v48 = vpop.permute.xlu0 %617  ;;  %v637_v49 = vpop.permute.xlu1 %636 }
 0x1e0   : > { %v576_v50 = vpop.permute.xlu0 %575  ;;  %v597_v51 = vpop.permute.xlu1 %596 }
 0x1e4   : > { %v536_v52 = vpop.permute.xlu0 %535  ;;  %v557_v53 = vpop.permute.xlu1 %556 }
 0x1e8   : > { %v492_v54 = vpop.permute.xlu0 %491  ;;  %v515_v55 = vpop.permute.xlu1 %514 }
 0x1ec   : > { %v635_v57 = vpop.permute.xlu0 %634  ;;  %v616_v58 = vpop.permute.xlu1 %615 }
 0x1ed   : > { %v640_v60 = vsel %vm638_vm6, %v635_v57, %v637_v49  ;;  %v639_v61 = vsel %vm638_vm6, %v633_v40, %v635_v57  ;;  %v621_v62 = vsel %vm619_vm9, %v616_v58, %v618_v48  ;;  %v620_v2 = vsel %vm619_vm9, %v614_v41, %v616_v58 }
 0x1ee   : > { %1128 = vmatprep.subr.msk.mxu1 %vm1373_vm7, %v640_v60 }
 0x1ef   : > { %1130 = vmatpush1.msk.msra.mxu1 %vm1377_vm8, %v639_v61 }
 0x1f0   : > { %v595_v0 = vpop.permute.xlu0 %594  ;;  %692 = vmatprep.subr.mxu1 %v621_v62  ;;  %v574_v1 = vpop.permute.xlu1 %573 }
 0x1f1   : > { %v599_v4 = vsel %vm598_vm10, %v593_v42, %v595_v0  ;;  %v600_v5 = vsel %vm598_vm10, %v595_v0, %v597_v51  ;;  %693 = vmatpush1.msra.mxu1 %v620_v2  ;;  %v579_v6 = vsel %vm577_vm12, %v574_v1, %v576_v50  ;;  %v578_v7 = vsel %vm577_vm12, %v572_v43, %v574_v1 }
 0x1f2   : > { %1132 = vmatprep.subr.msk.mxu1 %vm1388_vm11, %v600_v5 }
 0x1f3   : > { %1134 = vmatpush1.msk.msra.mxu1 %vm1393_vm13, %v599_v4 }
 0x1f4   : > { %v555_v8 = vpop.permute.xlu0 %554  ;;  %1136 = vmatprep.subr.msk.mxu1 %vm1373_vm7, %v579_v6  ;;  %v534_v9 = vpop.permute.xlu1 %533 }
 0x1f5   : > { %1138 = vmatpush1.msk.msra.mxu1 %vm1377_vm8, %v578_v7  ;;  %v560_v10 = vsel %vm558_vm14, %v555_v8, %v557_v53  ;;  %v559_v11 = vsel %vm558_vm14, %v553_v44, %v555_v8  ;;  %v539_v12 = vsel %vm537_vm15, %v534_v9, %v536_v52  ;;  %v538_v13 = vsel %vm537_vm15, %v532_v45, %v534_v9 }
 0x1f6   : > { %698 = vmatprep.subr.mxu1 %v560_v10 }
 0x1f7   : > { %699 = vmatpush1.msra.mxu1 %v559_v11 }
 0x1f8   : > { %v513_v14 = vpop.permute.xlu0 %512  ;;  %1140 = vmatprep.subr.msk.mxu1 %vm1388_vm11, %v539_v12  ;;  %v490_v15 = vpop.permute.xlu1 %489 }
 0x1f9   : > { %v517_v16 = vsel %vm516_vm0, %v511_v46, %v513_v14  ;;  %v518_v17 = vsel %vm516_vm0, %v513_v14, %v515_v55  ;;  %1142 = vmatpush1.msk.msra.mxu1 %vm1393_vm13, %v538_v13  ;;  %v495_v18 = vsel %vm493_vm1, %v490_v15, %v492_v54  ;;  %v494_v21 = vsel %vm493_vm1, %v1371_v47, %v490_v15 }
 0x1fa   : > { %1144 = vmatprep.subr.msk.mxu1 %vm1373_vm7, %v518_v17 }
 0x1fb   : > { %1146 = vmatpush1.msk.msra.mxu1 %vm1377_vm8, %v517_v16 }
 0x1fc   : > { %v469_v19 = vpop.permute.xlu0 %468  ;;  %704 = vmatprep.subr.mxu1 %v495_v18  ;;  %v471_v20 = vpop.permute.xlu1 %470 }
 0x1fd   : > { %v474_v22 = vsel %vm472_vm3, %v469_v19, %v471_v20  ;;  %705 = vmatpush1.msra.mxu1 %v494_v21 }
 0x1fe   : > { %1148 = vmatprep.subr.msk.mxu1 %vm1388_vm11, %v474_v22 }
 0x200   : > { %v467_v23 = vpop.permute.xlu0 %466 }
 0x201   : > { %v473_v25 = vsel %vm472_vm3, %v467_v23, %v469_v19 }
 0x202   : > { %1150 = vmatpush1.msk.msra.mxu1 %vm1393_vm13, %v473_v25 }
 0x203   : > { %1121 = vmatmul.mubr.msk.f32.vlgmr.msra.gmra.mxu1 %vm672_vm4, %v647_v24 }
 0x209   : > { %v670_v26 = vpop.permute.xlu1 %669 }
 0x2c3   : > { %v742_v27 = vpop.f32.mrf.mxu1 }
 0x2c4   : > { %v743_v28 = vadd.f32 %v742_v27, %v670_v26 }
 0x2c5   : > { %v744_v29 = vpop.f32.mrf.mxu1 }
 0x2c6   : > { %v747_v30 = vmax.f32 %v743_v28, 0.0  ;;  %v745_v31 = vadd.f32 %v744_v29, %v670_v26 }
 0x2c8   : > { %v748_v32 = vmax.f32 %v745_v31, 0.0  ;;  %754 = vrot.lane.b32.xlu0 %v747_v30, %s1211_s29 }
 0x2ca   : > { %756 = vrot.lane.b32.xlu1 %v748_v32, %s1211_s29 }
 0x33a   : > { %v755_v33 = vpop.permute.xlu0 %754 }
 0x33b   : > { %763 = vst.msk [vmem:[#allocation4] sm:$0xff] %vm762_vm5, %v755_v33 }
 0x33c   : > { %v757_v34 = vpop.permute.xlu1 %756 }
 0x33d   : > { %v758_v35 = vsel %vm338_vm2, %v755_v33, %v757_v34  ;;  %765 = vst.msk [vmem:[#allocation4 + $0x10] sm:$0xff] %vm338_vm2, %v757_v34 }
 0x342   : > { %v920_v36 = vld [vmem:[#allocation4] sm:$0xff] }
 0x343   : > { %926 = vrot.lane.b32.xlu0 %v920_v36, %s1212_s23  ;;  %908 = vrot.lane.b32.xlu1 %v920_v36, %s1213_s26 }
 0x344   : > { %v904_v37 = vld [vmem:[#allocation4 + $0x10] sm:$0xff] }
 0x347   : > { %888 = vrot.lane.b32.xlu0 %v920_v36, %s1214_s27  ;;  %868 = vrot.lane.b32.xlu1 %v920_v36, %s1215_s28 }
 0x34b   : > { %850 = vrot.lane.b32.xlu0 %v920_v36, %s1216_s30  ;;  %830 = vrot.lane.b32.xlu1 %v920_v36, %s1217_s8 }
 0x34f   : > { %810 = vrot.lane.b32.xlu0 %v920_v36, %s1218_s9  ;;  %792 = vrot.lane.b32.xlu1 %v920_v36, %s1219_s10 }
 0x353   : > { %912 = vrot.lane.b32.xlu0 %v904_v37, %s1213_s26  ;;  %930 = vrot.lane.b32.xlu1 %v904_v37, %s1212_s23 }
 0x357   : > { %872 = vrot.lane.b32.xlu0 %v904_v37, %s1215_s28  ;;  %892 = vrot.lane.b32.xlu1 %v904_v37, %s1214_s27 }
 0x35b   : > { %834 = vrot.lane.b32.xlu0 %v904_v37, %s1217_s8  ;;  %854 = vrot.lane.b32.xlu1 %v904_v37, %s1216_s30 }
 0x35f   : > { %796 = vrot.lane.b32.xlu0 %v904_v37, %s1219_s10  ;;  %814 = vrot.lane.b32.xlu1 %v904_v37, %s1218_s9 }
 0x363   : > { %928 = vrot.lane.b32.xlu0 %v758_v35, %s1212_s23  ;;  %910 = vrot.lane.b32.xlu1 %v758_v35, %s1213_s26 }
 0x367   : > { %890 = vrot.lane.b32.xlu0 %v758_v35, %s1214_s27  ;;  %870 = vrot.lane.b32.xlu1 %v758_v35, %s1215_s28 }
 0x36b   : > { %852 = vrot.lane.b32.xlu0 %v758_v35, %s1216_s30  ;;  %832 = vrot.lane.b32.xlu1 %v758_v35, %s1217_s8 }
 0x36f   : > { %812 = vrot.lane.b32.xlu0 %v758_v35, %s1218_s9  ;;  %794 = vrot.lane.b32.xlu1 %v758_v35, %s1219_s10 }
 0x373   : > { %776 = vrot.lane.b32.xlu1 %v904_v37, %s1221_s11  ;;  %774 = vrot.lane.b32.xlu0 %v758_v35, %s1221_s11 }
 0x377   : > { %962 = vperm.xlu1 %1199, %v959_v38   ;;  %772 = vrot.lane.b32.xlu0 %v920_v36, %s1221_s11 }
 0x3b5   : > { %v927_v39 = vpop.permute.xlu0 %926  ;;  %v909_v40 = vpop.permute.xlu1 %908 }
 0x3b9   : > { %v889_v41 = vpop.permute.xlu0 %888  ;;  %v869_v42 = vpop.permute.xlu1 %868 }
 0x3bd   : > { %v851_v43 = vpop.permute.xlu0 %850  ;;  %v831_v44 = vpop.permute.xlu1 %830 }
 0x3c1   : > { %v811_v45 = vpop.permute.xlu0 %810  ;;  %v793_v46 = vpop.permute.xlu1 %792 }
 0x3c5   : > { %v913_v47 = vpop.permute.xlu0 %912  ;;  %v931_v48 = vpop.permute.xlu1 %930 }
 0x3c9   : > { %v873_v49 = vpop.permute.xlu0 %872  ;;  %v893_v50 = vpop.permute.xlu1 %892 }
 0x3cd   : > { %v835_v51 = vpop.permute.xlu0 %834  ;;  %v855_v52 = vpop.permute.xlu1 %854 }
 0x3d1   : > { %v797_v53 = vpop.permute.xlu0 %796  ;;  %v815_v54 = vpop.permute.xlu1 %814 }
 0x3d5   : > { %v929_v55 = vpop.permute.xlu0 %928  ;;  %v911_v57 = vpop.permute.xlu1 %910 }
 0x3d6   : > { %v932_v58 = vsel %vm638_vm6, %v927_v39, %v929_v55  ;;  %v933_v60 = vsel %vm638_vm6, %v929_v55, %v931_v48  ;;  %v915_v61 = vsel %vm619_vm9, %v911_v57, %v913_v47  ;;  %v914_v62 = vsel %vm619_vm9, %v909_v40, %v911_v57 }
 0x3d7   : > { %1152 = vmatprep.subr.msk.mxu0 %vm1373_vm7, %v933_v60 }
 0x3d8   : > { %1154 = vmatpush1.msk.msra.mxu0 %vm1377_vm8, %v932_v58 }
 0x3d9   : > { %984 = vmatprep.subr.mxu0 %v915_v61  ;;  %v891_v0 = vpop.permute.xlu0 %890  ;;  %v871_v1 = vpop.permute.xlu1 %870 }
 0x3da   : > { %v894_v2 = vsel %vm598_vm10, %v889_v41, %v891_v0  ;;  %v895_v4 = vsel %vm598_vm10, %v891_v0, %v893_v50  ;;  %985 = vmatpush1.msra.mxu0 %v914_v62  ;;  %v875_v5 = vsel %vm577_vm12, %v871_v1, %v873_v49  ;;  %v874_v6 = vsel %vm577_vm12, %v869_v42, %v871_v1 }
 0x3db   : > { %1156 = vmatprep.subr.msk.mxu0 %vm1388_vm11, %v895_v4 }
 0x3dc   : > { %1158 = vmatpush1.msk.msra.mxu0 %vm1393_vm13, %v894_v2 }
 0x3dd   : > { %1160 = vmatprep.subr.msk.mxu0 %vm1373_vm7, %v875_v5  ;;  %v853_v7 = vpop.permute.xlu0 %852  ;;  %v833_v8 = vpop.permute.xlu1 %832 }
 0x3de   : > { %v856_v9 = vsel %vm558_vm14, %v851_v43, %v853_v7  ;;  %1162 = vmatpush1.msk.msra.mxu0 %vm1377_vm8, %v874_v6  ;;  %v857_v10 = vsel %vm558_vm14, %v853_v7, %v855_v52  ;;  %v837_v11 = vsel %vm537_vm15, %v833_v8, %v835_v51  ;;  %v836_v12 = vsel %vm537_vm15, %v831_v44, %v833_v8 }
 0x3df   : > { %990 = vmatprep.subr.mxu0 %v857_v10 }
 0x3e0   : > { %991 = vmatpush1.msra.mxu0 %v856_v9 }
 0x3e1   : > { %1164 = vmatprep.subr.msk.mxu0 %vm1388_vm11, %v837_v11  ;;  %v813_v13 = vpop.permute.xlu0 %812  ;;  %v795_v14 = vpop.permute.xlu1 %794 }
 0x3e2   : > { %v816_v15 = vsel %vm516_vm0, %v811_v45, %v813_v13  ;;  %v817_v16 = vsel %vm516_vm0, %v813_v13, %v815_v54  ;;  %1166 = vmatpush1.msk.msra.mxu0 %vm1393_vm13, %v836_v12  ;;  %v799_v17 = vsel %vm493_vm1, %v795_v14, %v797_v53  ;;  %v798_v18 = vsel %vm493_vm1, %v793_v46, %v795_v14 }
 0x3e3   : > { %1168 = vmatprep.subr.msk.mxu0 %vm1373_vm7, %v817_v16 }
 0x3e4   : > { %1170 = vmatpush1.msk.msra.mxu0 %vm1377_vm8, %v816_v15 }
 0x3e5   : > { %996 = vmatprep.subr.mxu0 %v799_v17  ;;  %v777_v19 = vpop.permute.xlu1 %776  ;;  %v775_v20 = vpop.permute.xlu0 %774 }
 0x3e6   : > { %v779_v21 = vsel %vm472_vm3, %v775_v20, %v777_v19  ;;  %997 = vmatpush1.msra.mxu0 %v798_v18 }
 0x3e7   : > { %1172 = vmatprep.subr.msk.mxu0 %vm1388_vm11, %v779_v21 }
 0x3e9   : > { %v773_v22 = vpop.permute.xlu0 %772 }
 0x3ea   : > { %v778_v59 = vsel %vm472_vm3, %v773_v22, %v775_v20 }
 0x3eb   : > { %1174 = vmatpush1.msk.msra.mxu0 %vm1393_vm13, %v778_v59 }
 0x3ec   : > { %1122 = vmatmul.mubr.msk.f32.vlgmr.msra.gmra.mxu0 %vm672_vm4, %v940_v56 }
 0x3f2   : > { %v963_v23 = vpop.permute.xlu1 %962 }
 0x4ac   : > { %v1034_v24 = vpop.f32.mrf.mxu0 }
 0x4ad   : > { %v1035_v25 = vadd.f32 %v1034_v24, %v963_v23 }
 0x4ae   : > { %v1036_v63 = vpop.f32.mrf.mxu0 }
 0x4af   : > { %v1039_v26 = vmax.f32 %v1035_v25, 0.0  ;;  %v1037_v27 = vadd.f32 %v1036_v63, %v963_v23 }
 0x4b1   : > { %1041 = vst [vmem:[%s295_s22] sm:$0xff] %v1039_v26  ;;  %v1040_v28 = vmax.f32 %v1037_v27, 0.0 }
 0x4b3   : > { %1042 = vst [vmem:[%s295_s22 + $0x8] sm:$0xff] %v1040_v28 }
 0x4b4 PF: > { %s17_s24 = sadd.s32 1, %s1208_s24  }
 0x4b5   : > { %p14_p4 = scmp.ge.s32.totalorder %s17_s24, 4  }
 0x4b7   :  { %16 = sbr.rel (!%p14_p4) target bundleno = 1 (0x1), region = 81 }

</bundles_post_ra>
